<compile_context>
chip_gen: v6e
topology: v6e:2x2x1
jax: 0.10.0
libtpu: 0.0.40
codegen_flags: <defaults>
</compile_context>

<pallas_src>
import functools

import jax
import jax.numpy as jnp
from jax.experimental import pallas as pl
from jax.experimental.pallas import tpu as pltpu

_LANES = 128
_X_PAD = 100.0   # sigmoid(+100) == 1 (e = exp(-100) flushes to 0)
_LAB_PAD = 1     # with label 1 and x = +100, both h_pos and h_neg are exactly 0


def _round_up(x, m):
    return ((x + m - 1) // m) * m


def _sublane_pack(dtype):
    # f32 -> 8 sublanes, bf16 -> 16, int8/bool -> 32 (packed sublane tiling).
    return 8 * max(1, 4 // jnp.dtype(dtype).itemsize)


def _rcloss_kernel(x_ref, lab_ref, part_ref):
    """Processes one (tile_rows, 128) slab and accumulates into part_ref.

    part_ref is this core's (1, 8, 128) output block; its block index is
    constant along the inner (reduction) grid axis, so it stays resident in
    VMEM and doubles as the accumulator (init at i==0, writeback at the end).
    """
    i = pl.program_id(1)

    @pl.when(i == 0)
    def _():
        part_ref[...] = jnp.zeros_like(part_ref)

    x = x_ref[...].astype(jnp.float32)       # (tile_rows, 128) logits (col 0)
    lab = lab_ref[...].astype(jnp.float32)   # (tile_rows, 128) labels in {0,1}

    # 2 transcendentals / element:
    #   e = exp(-x); sigmoid = 1/(1+e); 1-sigmoid = e/(1+e)
    #   log(sigmoid) = -log1p(e); log(1-sigmoid) = -x - log1p(e)
    # pl.reciprocal(approx=True) keeps the divide on the EUP (VALU has no
    # Newton-refinement work to do).
    e = jnp.exp(-x)                          # EUP
    inv = pl.reciprocal(1.0 + e, approx=True)
    outs = inv                               # sigmoid(x)
    neg_outs = e * inv                       # 1 - sigmoid(x)
    log_outs = -jnp.log1p(e)                 # log(sigmoid(x))
    log_neg_outs = log_outs - x              # log(1 - sigmoid(x))

    # NOTE: for x << 0 with label == 0, log_outs -> -inf and 0*(-inf) -> NaN.
    # This exactly mirrors the PyTorch reference; no extra hardening added.
    h_pos = neg_outs * lab * log_outs
    h_neg = outs * (1.0 - lab) * log_neg_outs
    term = -2.0 * h_pos - h_neg              # (tile_rows, 128)

    # Padded elements (x = +100, label = 1) contribute exactly 0, so no
    # validity mask is required.

    # Pure full-vreg VPU accumulation onto the resident (8, 128) block; the
    # cross-sublane/lane reduction is deferred to the wrapper epilogue.
    part_ref[0] += term.reshape(-1, 8, _LANES).sum(axis=0)


@functools.partial(jax.jit, static_argnames=("max_tile_rows", "num_cores"))
def rc_loss(output, labels, *, max_tile_rows=4096, num_cores=2):
    """output: (B, C) logits; labels: (B,) or (B, 1) in {0,1}. Scalar f32 loss.

    Logits/labels may be f32 or bf16 (etc.); narrow dtypes stay narrow through
    HBM and are upcast inside the kernel.
    """
    B = output.shape[0]
    assert labels.shape[0] == B

    # Only logit column 0 is used; keep original dtypes (no wrapper upcast).
    x = output[:, 0]
    lab = labels.reshape(B)

    # Lane-dense (rows, 128) slabs, sublane-aligned for the input dtypes.
    row_align = max(_sublane_pack(x.dtype), _sublane_pack(lab.dtype), 8)
    rows = max(1, -(-B // _LANES))

    # Big tiles for HBM-roofline efficiency, capped so the double-buffered
    # working set (2 inputs x 2 buffers) stays within v5e's 16 MiB scoped-VMEM
    # default even for user-supplied max_tile_rows.
    max_itemsize = max(jnp.dtype(x.dtype).itemsize, jnp.dtype(lab.dtype).itemsize)
    cap_rows = max(row_align, (3 << 20) // (_LANES * max_itemsize))
    tile_rows = min(max_tile_rows, _round_up(rows, row_align), cap_rows)
    tile_rows = max(_round_up(tile_rows, row_align), row_align)

    # Grid: (cores "parallel", tiles-per-core "arbitrary"). On v7x the outer
    # axis shards the reduction across the 2 TensorCores; on v5e/v6e it is a
    # nearly free sequential outer loop.
    tiles = -(-rows // tile_rows)
    nc = max(1, min(num_cores, tiles))
    tiles = _round_up(tiles, nc)
    rows = tiles * tile_rows
    tiles_per_core = tiles // nc

    # Padding chosen so padded elements contribute exactly zero loss.
    n_pad = rows * _LANES - B
    x_slab = jnp.pad(x, (0, n_pad), constant_values=_X_PAD).reshape(rows, _LANES)
    lab_slab = jnp.pad(lab, (0, n_pad), constant_values=_LAB_PAD).reshape(rows, _LANES)

    partials = pl.pallas_call(
        _rcloss_kernel,
        out_shape=jax.ShapeDtypeStruct((nc, 8, _LANES), jnp.float32),
        grid=(nc, tiles_per_core),
        in_specs=[
            pl.BlockSpec((tile_rows, _LANES),
                         lambda c, i, t=tiles_per_core: (c * t + i, 0)),
            pl.BlockSpec((tile_rows, _LANES),
                         lambda c, i, t=tiles_per_core: (c * t + i, 0)),
        ],
        out_specs=pl.BlockSpec((1, 8, _LANES), lambda c, i: (c, 0, 0)),
        compiler_params=pltpu.CompilerParams(
            dimension_semantics=("parallel", "arbitrary")),
    )(x_slab, lab_slab)

    # Tiny final reduce (nc * 8 * 128 f32) + normalization, fused under jit.
    return jnp.sum(partials) * jnp.float32(1.0 / B)


def rc_loss_ref(output, labels):
    # Pure-JAX reference mirroring the PyTorch module exactly.
    outs = jax.nn.sigmoid(output[:, :1].astype(jnp.float32))
    labels = labels.reshape(-1, 1).astype(jnp.float32)
    neg_labels = 1.0 - labels
    neg_outs = 1.0 - outs
    pos_loss = labels * jnp.log(outs)
    neg_loss = neg_labels * jnp.log(neg_outs)
    h_pos = neg_outs * pos_loss
    h_neg = outs * neg_loss
    return -2.0 * h_pos.mean() - h_neg.mean()


if __name__ == "__main__":
    key = jax.random.PRNGKey(0)
    k1, k2, k3, k4 = jax.random.split(key, 4)

    # Tolerance note: the kernel uses the EUP approximate reciprocal
    # (pl.reciprocal(approx=True), ~1e-4 relative) vs. exact division in the
    # reference, and the loss is a sum of non-negative terms (no cancellation),
    # so rtol=2e-3 is a comfortably tight bound.
    RTOL, ATOL = 2e-3, 1e-6

    # Case 1: small shapes matching the module (batch=8, 4 logit columns).
    B, C = 8, 4
    output = jax.random.normal(k1, (B, C), dtype=jnp.float32)
    labels = jax.random.bernoulli(k2, p=0.5, shape=(B, 1)).astype(jnp.float32)
    loss = jax.block_until_ready(rc_loss(output, labels))
    ref = jax.block_until_ready(rc_loss_ref(output, labels))
    assert jnp.isfinite(loss), "loss is not finite"
    assert jnp.allclose(loss, ref, rtol=RTOL, atol=ATOL), (loss, ref)

    # Case 2: larger B with a tiny tile, exercising the multi-tile reduction,
    # the 2-way "parallel" core split and the zero-contribution padding.
    B2, C2 = 2500, 4
    output2 = jax.random.normal(k3, (B2, C2), dtype=jnp.float32)
    labels2 = jax.random.bernoulli(k4, p=0.5, shape=(B2, 1)).astype(jnp.float32)
    loss2 = jax.block_until_ready(rc_loss(output2, labels2, max_tile_rows=8))
    ref2 = jax.block_until_ready(rc_loss_ref(output2, labels2))
    assert jnp.isfinite(loss2), "loss2 is not finite"
    assert jnp.allclose(loss2, ref2, rtol=RTOL, atol=ATOL), (loss2, ref2)

    # Case 3: bf16 logits/labels stay bf16 through HBM and are upcast in-kernel
    # (exercises the 16-sublane alignment path and halves HBM traffic).
    out_bf16 = output2.astype(jnp.bfloat16)
    lab_bf16 = labels2.astype(jnp.bfloat16)
    loss3 = jax.block_until_ready(rc_loss(out_bf16, lab_bf16))
    ref3 = jax.block_until_ready(
        rc_loss_ref(out_bf16.astype(jnp.float32), lab_bf16.astype(jnp.float32)))
    assert jnp.isfinite(loss3), "loss3 is not finite"
    assert jnp.allclose(loss3, ref3, rtol=RTOL, atol=ATOL), (loss3, ref3)

    print("KERNEL_OK")
</pallas_src>

<mosaic_0001>
module attributes {stable_mosaic.version = 11 : i64} {
  func.func @_rcloss_kernel(%arg0: i32, %arg1: i32, %arg2: memref<8x128xf32, #tpu.memory_space<vmem>>, %arg3: memref<8x128xf32, #tpu.memory_space<vmem>>, %arg4: memref<1x8x128xf32, #tpu.memory_space<vmem>>) attributes {dimension_semantics = [#tpu.dimension_semantics<parallel>, #tpu.dimension_semantics<arbitrary>], iteration_bounds = array<i64: 1, 1>, scalar_prefetch = 0 : i64, scratch_operands = 0 : i64, tpu.core_type = #tpu.core_type<tc>, window_params = [{transform_indices = @transform_0, window_bounds = array<i64: 8, 128>}, {transform_indices = @transform_1, window_bounds = array<i64: 8, 128>}, {transform_indices = @transform_2, window_bounds = array<i64: 1, 8, 128>}]} {
    %c0_i32 = arith.constant 0 : i32
    %0 = arith.cmpi eq, %arg1, %c0_i32 : i32
    %1 = arith.extui %0 : i1 to i32
    %c0_i32_0 = arith.constant 0 : i32
    %2 = arith.cmpi ne, %1, %c0_i32_0 : i32
    scf.if %2 {
      %cst_15 = arith.constant 0.000000e+00 : f32
      %33 = vector.broadcast %cst_15 : f32 to vector<1x8x128xf32>
      %c0_16 = arith.constant 0 : index
      %c0_17 = arith.constant 0 : index
      %c0_18 = arith.constant 0 : index
      %34 = vector.load %arg4[%c0_16, %c0_17, %c0_18] : memref<1x8x128xf32, #tpu.memory_space<vmem>>, vector<1x8x128xf32>
      tpu.vector_store %arg4[%c0_16, %c0_17, %c0_18], %33 {strides = array<i32>} : memref<1x8x128xf32, #tpu.memory_space<vmem>>, vector<1x8x128xf32>,
    } else {
    }
    %c0 = arith.constant 0 : index
    %c0_1 = arith.constant 0 : index
    %3 = vector.load %arg2[%c0, %c0_1] : memref<8x128xf32, #tpu.memory_space<vmem>>, vector<8x128xf32>
    %c0_2 = arith.constant 0 : index
    %c0_3 = arith.constant 0 : index
    %4 = vector.load %arg3[%c0_2, %c0_3] : memref<8x128xf32, #tpu.memory_space<vmem>>, vector<8x128xf32>
    %cst = arith.constant 0.000000e+00 : f32
    %5 = vector.broadcast %cst : f32 to vector<8x128xf32>
    %6 = arith.subf %5, %3 : vector<8x128xf32>
    %7 = math.exp %6 : vector<8x128xf32>
    %cst_4 = arith.constant 1.000000e+00 : f32
    %8 = vector.broadcast %cst_4 : f32 to vector<8x128xf32>
    %9 = arith.addf %8, %7 : vector<8x128xf32>
    %10 = tpu.reciprocal %9 {approx = true} : vector<8x128xf32> -> vector<8x128xf32>
    %11 = arith.mulf %7, %10 : vector<8x128xf32>
    %12 = math.log1p %7 : vector<8x128xf32>
    %cst_5 = arith.constant 0.000000e+00 : f32
    %13 = vector.broadcast %cst_5 : f32 to vector<8x128xf32>
    %14 = arith.subf %13, %12 : vector<8x128xf32>
    %15 = arith.subf %14, %3 : vector<8x128xf32>
    %16 = arith.mulf %11, %4 : vector<8x128xf32>
    %17 = arith.mulf %16, %14 : vector<8x128xf32>
    %cst_6 = arith.constant 1.000000e+00 : f32
    %18 = vector.broadcast %cst_6 : f32 to vector<8x128xf32>
    %19 = arith.subf %18, %4 : vector<8x128xf32>
    %20 = arith.mulf %10, %19 : vector<8x128xf32>
    %21 = arith.mulf %20, %15 : vector<8x128xf32>
    %cst_7 = arith.constant -2.000000e+00 : f32
    %22 = vector.broadcast %cst_7 : f32 to vector<8x128xf32>
    %23 = arith.mulf %22, %17 : vector<8x128xf32>
    %24 = arith.subf %23, %21 : vector<8x128xf32>
    %c0_8 = arith.constant 0 : index
    %c0_9 = arith.constant 0 : index
    %c0_10 = arith.constant 0 : index
    %25 = vector.load %arg4[%c0_8, %c0_9, %c0_10] : memref<1x8x128xf32, #tpu.memory_space<vmem>>, vector<1x8x128xf32>
    %26 = vector.shape_cast %25 : vector<1x8x128xf32> to vector<8x128xf32>
    %27 = vector.shape_cast %24 : vector<8x128xf32> to vector<1x8x128xf32>
    %cst_11 = arith.constant dense<0.000000e+00> : vector<8x128xf32>
    %28 = vector.multi_reduction <add>, %27, %cst_11 [0] : vector<1x8x128xf32> to vector<8x128xf32>
    %29 = arith.addf %26, %28 : vector<8x128xf32>
    %c0_12 = arith.constant 0 : index
    %c0_13 = arith.constant 0 : index
    %c0_14 = arith.constant 0 : index
    %30 = vector.load %arg4[%c0_12, %c0_13, %c0_14] : memref<1x8x128xf32, #tpu.memory_space<vmem>>, vector<1x8x128xf32>
    %31 = vector.shape_cast %30 : vector<1x8x128xf32> to vector<8x128xf32>
    %32 = vector.shape_cast %29 : vector<8x128xf32> to vector<1x8x128xf32>
    tpu.vector_store %arg4[%c0_12, %c0_13, %c0_14], %32 {strides = array<i32>} : memref<1x8x128xf32, #tpu.memory_space<vmem>>, vector<1x8x128xf32>,
    return
  }
  func.func @transform_0(%arg0: i32, %arg1: i32) -> (i32, i32) {
    %c1_i32 = arith.constant 1 : i32
    %0 = arith.muli %arg0, %c1_i32 : i32
    %1 = arith.addi %0, %arg1 : i32
    %c0_i32 = arith.constant 0 : i32
    %c0_i32_0 = arith.constant 0 : i32
    return %1, %c0_i32 : i32, i32
  }
  func.func @transform_1(%arg0: i32, %arg1: i32) -> (i32, i32) {
    %c1_i32 = arith.constant 1 : i32
    %0 = arith.muli %arg0, %c1_i32 : i32
    %1 = arith.addi %0, %arg1 : i32
    %c0_i32 = arith.constant 0 : i32
    %c0_i32_0 = arith.constant 0 : i32
    return %1, %c0_i32 : i32, i32
  }
  func.func @transform_2(%arg0: i32, %arg1: i32) -> (i32, i32, i32) {
    %c0_i32 = arith.constant 0 : i32
    %c0_i32_0 = arith.constant 0 : i32
    %c0_i32_1 = arith.constant 0 : i32
    return %arg0, %c0_i32, %c0_i32_0 : i32, i32, i32
  }
}

</mosaic_0001>

<bundles_post_ra>
// kernel: rc_loss.1
= control target key start
LH: loop header
LB: loop body
LE: loop exit
PB: predicated region body
PF: predicated region fallthrough
CT: control target
= control target key end

     0   :  { %s127_s0 = inlined_call_operand.vmem [shape: f32[8,128], index: 0, kind: input, shape index: {}]   ;;  %s128_s1 = inlined_call_operand.vmem [shape: f32[8,128], index: 1, kind: input, shape index: {}]   ;;  %s129_s2 = inlined_call_operand.vmem [shape: f32[1,8,128], index: 2, kind: output, shape index: {}]  }
   0x1   :  { %v50_v0 = vld [vmem:[%s127_s0] sm:$0xff] }
   0x2   :  { %v52_v1 = vsub.f32 0.0, %v50_v0  ;;  %v51_v8 = vld [vmem:[%s128_s1] sm:$0xff] }
   0x3   :  { %v71_v13 = vsub.f32 1.0, %v51_v8 }
   0x4   :  { %v53_v2 = vmul.f32 1.442695, %v52_v1 }
   0x6   :  { %97 = vpow2.f32 %v53_v2 }
  0x13   :  { %v98_v3 = vpop.eup %97 }
  0x14   :  { %v55_v4 = vadd.f32 1.0, %v98_v3  ;;  %v61_v5 = vmul.f32 -0.5, %v98_v3  ;;  %v64_v7 = vand.u32 2147483647, %v98_v3 }
  0x16   :  { %99 = vrcp.f32 %v55_v4  ;;  %v62_v6 = vadd.f32 1.0, %v61_v5  ;;  %vm65_vm0 = vcmp.lt.f32.partialorder %v64_v7, 0.0004427343 }
  0x17   :  { %101 = vlog2.f32 %v55_v4 }
  0x18   :  { %v63_v10 = vmul.f32 %v98_v3, %v62_v6 }
  0x23   :  { %v100_v9 = vpop.eup %99 }
  0x24   :  { %v102_v11 = vpop.eup %101  ;;  %v57_v12 = vmul.f32 %v100_v9, %v98_v3  ;;  %v72_v18 = vmul.f32 %v100_v9, %v71_v13 }
  0x25   :  { %v60_v14 = vmul.f32 0.6931472, %v102_v11 }
  0x26   :  { %v69_v15 = vmul.f32 %v57_v12, %v51_v8 }
  0x27   :  { %v66_v16 = vsel %vm65_vm0, %v63_v10, %v60_v14 }
  0x28   :  { %v67_v17 = vsub.f32 0.0, %v66_v16 }
  0x2a   :  { %v68_v19 = vsub.f32 %v67_v17, %v50_v0  ;;  %v70_v20 = vmul.f32 %v69_v15, %v67_v17 }
  0x2c   :  { %v73_v21 = vmul.f32 %v72_v18, %v68_v19  ;;  %v74_v22 = vmul.f32 -2.0, %v70_v20 }
  0x2e   :  { %v75_v23 = vsub.f32 %v74_v22, %v73_v21 }
  0x30   :  { %79 = vst [vmem:[%s129_s2] sm:$0xff] %v75_v23 }

</bundles_post_ra>
